<compile_context>
chip_gen: v6e
topology: v6e:2x2x1
jax: 0.10.0
libtpu: 0.0.40
codegen_flags: <defaults>
</compile_context>

<pallas_src>
import functools

import jax
import jax.numpy as jnp
from jax.experimental import pallas as pl
from jax.experimental.pallas import tpu as pltpu


def _round_up(v, m):
    return ((v + m - 1) // m) * m


def _vmem_budget_bytes():
    """Per-TensorCore VMEM capacity; conservative fallback = 64 MiB (v7x/TC)."""
    try:
        return int(pltpu.get_tpu_info().vmem_capacity_bytes)
    except Exception:
        return 64 << 20


def _grn_kernel(x_ref, gamma_ref, beta_ref, o_ref, ssq_ref, scale_ref, *res,
                hw, tile_rows, inv_c, resident, ragged):
    """x_ref/o_ref: (tile_rows, C); gamma/beta: (1, C); ssq/scale: (1, C) f32.

    res (optional): persistent (n_tiles * tile_rows, C) VMEM copy of this
    batch's x, used as the phase-1 source when `resident` is True.
    """
    phase = pl.program_id(1)
    t = pl.program_id(2)

    # ---- phase 0, first tile: reset the per-channel sum-of-squares.
    @pl.when(jnp.logical_and(phase == 0, t == 0))
    def _init():
        ssq_ref[...] = jnp.zeros_like(ssq_ref)

    # ---- phase 0: accumulate per-channel sum of squares over spatial tiles.
    @pl.when(phase == 0)
    def _reduce():
        x = x_ref[...].astype(jnp.float32)                        # (T, C)
        if ragged:
            # Last tile extends past HW: the padded rows hold unspecified
            # data, so zero them before squaring.
            row = t * tile_rows + jax.lax.broadcasted_iota(jnp.int32, x.shape, 0)
            x = jnp.where(row < hw, x, 0.0)
        ssq_ref[...] += jnp.sum(x * x, axis=0, keepdims=True)     # (1, C)
        if resident:
            start = pl.multiple_of(t * tile_rows, tile_rows)
            res[0][pl.ds(start, tile_rows), :] = x_ref[...]       # stash in VMEM

    # ---- phase 1, first tile: fold gamma * Nx + 1 into one per-channel scale.
    @pl.when(jnp.logical_and(phase == 1, t == 0))
    def _finalize_scale():
        gx = jnp.sqrt(ssq_ref[...])                               # (1, C)
        gx_mean = jnp.sum(gx, axis=-1, keepdims=True) * inv_c
        # One scalar per batch: use an exact divide (approx reciprocal would
        # inject ~1e-4 relative error for zero performance gain).
        nx = gx / (gx_mean + 1e-6)
        scale_ref[...] = gamma_ref[...].astype(jnp.float32) * nx + 1.0

    # ---- phase 1: apply  out = x * s + beta.
    @pl.when(phase == 1)
    def _apply():
        if resident:
            start = pl.multiple_of(t * tile_rows, tile_rows)
            x = res[0][pl.ds(start, tile_rows), :].astype(jnp.float32)
        else:
            x = x_ref[...].astype(jnp.float32)
        out = x * scale_ref[...] + beta_ref[...].astype(jnp.float32)
        o_ref[...] = out.astype(o_ref.dtype)


def grn(x, gamma, beta, *, tile_rows=None, resident=None):
    """GRN forward.  x: (N, H, W, C); gamma, beta: (1, 1, 1, C)."""
    N, H, W, C = x.shape
    HW = H * W
    itemsize = jnp.dtype(x.dtype).itemsize
    sub = max(8, 32 // itemsize)          # sublane multiple: 8 f32 / 16 bf16 / 32 i8
    lane_c = _round_up(C, 128)            # lane-padded width (VMEM footprint only)

    budget = _vmem_budget_bytes()
    # ~2 MiB tiles on v7x (64 MiB/TC), ~4 MiB on v5e/v6e (128 MiB).
    target_tile_bytes = (4 << 20) if budget >= (100 << 20) else (2 << 20)

    if tile_rows is None:
        by_budget = max(sub, (target_tile_bytes // (lane_c * itemsize)) // sub * sub)
        tile_rows = HW if HW <= by_budget else by_budget
    tile_rows = min(tile_rows, HW)
    assert tile_rows == HW or tile_rows % sub == 0, (tile_rows, sub)

    n_tiles = pl.cdiv(HW, tile_rows)
    ragged = (HW % tile_rows) != 0

    x_flat = x.reshape(N, HW, C)
    gamma2 = gamma.reshape(1, C)
    beta2 = beta.reshape(1, C)

    # VMEM budgeting (lane/sublane padded footprints).
    tile_vmem = _round_up(tile_rows, sub) * lane_c * itemsize
    resident_bytes = _round_up(n_tiles * tile_rows, sub) * lane_c * itemsize
    resident_cap = max(0, min(budget * 5 // 8, budget - 8 * tile_vmem - (8 << 20)))
    if resident is None:
        # With a single tile per batch the input block is already reused in
        # phase 1 (same block index), so residency only helps for n_tiles > 1.
        resident = (n_tiles > 1) and (resident_bytes <= resident_cap)

    f32_tmp = 2 * _round_up(tile_rows, 8) * lane_c * 4
    vmem_need = (4 * tile_vmem + f32_tmp
                 + (resident_bytes if resident else 0)
                 + 2 * 8 * lane_c * 4          # (1, C) f32 scratches
                 + (2 << 20))                  # headroom
    vmem_limit = int(min(budget, max(vmem_need, 16 << 20)))

    last_tile = n_tiles - 1
    if resident:
        # Phase 0 streams tiles; phase 1 pins the index at the last phase-0
        # tile so no new HBM fetches are issued (data comes from the scratch).
        def x_index_map(n, p, t):
            return (n, t + p * (last_tile - t), 0)
    else:
        def x_index_map(n, p, t):
            return (n, t, 0)

    def out_index_map(n, p, t):
        # Phase 0 pins the output block index at (n, 0, 0) so the (unwritten)
        # buffer is never flushed; phase 1 streams real tiles.
        return (n, p * t, 0)

    scratch_shapes = [
        pltpu.VMEM((1, C), jnp.float32),   # per-channel sum(x^2)
        pltpu.VMEM((1, C), jnp.float32),   # per-channel scale s
    ]
    if resident:
        scratch_shapes.append(pltpu.VMEM((n_tiles * tile_rows, C), x.dtype))

    kernel = functools.partial(
        _grn_kernel, hw=HW, tile_rows=tile_rows, inv_c=1.0 / C,
        resident=resident, ragged=ragged)

    n_reads = 1 if (resident or n_tiles == 1) else 2
    cost = pl.CostEstimate(
        flops=4 * N * HW * C,
        transcendentals=N * C,                                     # sqrt per chan
        bytes_accessed=(n_reads + 1) * N * HW * C * itemsize,
    )

    out_flat = pl.pallas_call(
        kernel,
        out_shape=jax.ShapeDtypeStruct((N, HW, C), x.dtype),
        grid_spec=pltpu.PrefetchScalarGridSpec(
            num_scalar_prefetch=0,
            # (batch, phase, spatial tile); batch is "parallel" so v7x's two
            # TensorCores split batches (N == 1 leaves one core idle).
            grid=(N, 2, n_tiles),
            in_specs=[
                pl.BlockSpec((None, tile_rows, C), x_index_map),
                pl.BlockSpec((1, C), lambda n, p, t: (0, 0)),
                pl.BlockSpec((1, C), lambda n, p, t: (0, 0)),
            ],
            out_specs=pl.BlockSpec((None, tile_rows, C), out_index_map),
            scratch_shapes=scratch_shapes,
        ),
        compiler_params=pltpu.CompilerParams(
            dimension_semantics=("parallel", "arbitrary", "arbitrary"),
            vmem_limit_bytes=vmem_limit,
        ),
        cost_estimate=cost,
    )(x_flat, gamma2, beta2)

    return out_flat.reshape(N, H, W, C)


def grn_reference(x, gamma, beta):
    gx = jnp.sqrt(jnp.sum(x * x, axis=(1, 2), keepdims=True))
    nx = gx / (jnp.mean(gx, axis=-1, keepdims=True) + 1e-6)
    return gamma * (x * nx) + beta + x


if __name__ == "__main__":
    key = jax.random.PRNGKey(0)
    kx, kg, kb = jax.random.split(key, 3)

    def run_case(shape, dtype, tol, **kw):
        n, h, w, c = shape
        x = jax.random.normal(kx, shape, dtype=jnp.float32)
        g = 0.1 * jax.random.normal(kg, (1, 1, 1, c), dtype=jnp.float32)
        b = 0.1 * jax.random.normal(kb, (1, 1, 1, c), dtype=jnp.float32)
        x, g, b = x.astype(dtype), g.astype(dtype), b.astype(dtype)
        out = jax.block_until_ready(grn(x, g, b, **kw))
        ref = grn_reference(x.astype(jnp.float32), g.astype(jnp.float32),
                            b.astype(jnp.float32)).astype(dtype)
        assert out.shape == ref.shape and out.dtype == x.dtype
        err = float(jnp.max(jnp.abs(out.astype(jnp.float32)
                                    - ref.astype(jnp.float32))))
        assert err <= tol, (shape, str(dtype), err)

    # 1) Small NHWC shape from the module; single spatial tile per batch.
    run_case((2, 16, 16, 32), jnp.float32, 1e-4)
    # 2) Multi-tile reduce/apply with the VMEM-resident phase-1 path.
    run_case((2, 8, 8, 128), jnp.float32, 1e-4, tile_rows=8)
    # 3) Same, but forcing the streaming (second HBM read) path.
    run_case((2, 8, 8, 128), jnp.float32, 1e-4, tile_rows=8, resident=False)
    # 4) Ragged last spatial tile + channel count that is not a multiple of 128.
    run_case((1, 5, 7, 24), jnp.float32, 1e-4, tile_rows=16)
    # 5) bf16 input exercises the dtype-aware (16-row sublane) tiling.
    run_case((2, 16, 16, 64), jnp.bfloat16, 3e-2, tile_rows=32)

    print("KERNEL_OK")
</pallas_src>

<mosaic_0001>
module attributes {stable_mosaic.version = 11 : i64} {
  func.func @_grn_kernel(%arg0: i32, %arg1: i32, %arg2: i32, %arg3: memref<1x256x32xf32, #tpu.memory_space<vmem>>, %arg4: memref<1x32xf32, #tpu.memory_space<vmem>>, %arg5: memref<1x32xf32, #tpu.memory_space<vmem>>, %arg6: memref<1x256x32xf32, #tpu.memory_space<vmem>>, %arg7: memref<1x32xf32, #tpu.memory_space<vmem>>, %arg8: memref<1x32xf32, #tpu.memory_space<vmem>>) attributes {dimension_semantics = [#tpu.dimension_semantics<parallel>, #tpu.dimension_semantics<arbitrary>, #tpu.dimension_semantics<arbitrary>], iteration_bounds = array<i64: 2, 2, 1>, scalar_prefetch = 0 : i64, scratch_operands = 2 : i64, tpu.core_type = #tpu.core_type<tc>, window_params = [{transform_indices = @transform_0, window_bounds = array<i64: 1, 256, 32>}, {pipeline_mode = #tpu.pipeline_mode<synchronous>, transform_indices = @transform_1, window_bounds = array<i64: 1, 32>}, {pipeline_mode = #tpu.pipeline_mode<synchronous>, transform_indices = @transform_2, window_bounds = array<i64: 1, 32>}, {transform_indices = @transform_3, window_bounds = array<i64: 1, 256, 32>}]} {
    %c0_i32 = arith.constant 0 : i32
    %0 = arith.cmpi eq, %arg1, %c0_i32 : i32
    %c0_i32_0 = arith.constant 0 : i32
    %1 = arith.cmpi eq, %arg2, %c0_i32_0 : i32
    %2 = arith.andi %0, %1 : i1
    %3 = arith.extui %2 : i1 to i32
    %c0_i32_1 = arith.constant 0 : i32
    %4 = arith.cmpi ne, %3, %c0_i32_1 : i32
    scf.if %4 {
      %cst = arith.constant 0.000000e+00 : f32
      %16 = vector.broadcast %cst : f32 to vector<1x32xf32>
      %c0 = arith.constant 0 : index
      %c0_8 = arith.constant 0 : index
      %17 = vector.load %arg7[%c0, %c0_8] : memref<1x32xf32, #tpu.memory_space<vmem>>, vector<1x32xf32>
      tpu.vector_store %arg7[%c0, %c0_8], %16 {strides = array<i32>} : memref<1x32xf32, #tpu.memory_space<vmem>>, vector<1x32xf32>,
    } else {
    }
    %c0_i32_2 = arith.constant 0 : i32
    %5 = arith.cmpi eq, %arg1, %c0_i32_2 : i32
    %6 = arith.extui %5 : i1 to i32
    %c0_i32_3 = arith.constant 0 : i32
    %7 = arith.cmpi ne, %6, %c0_i32_3 : i32
    scf.if %7 {
      %c0 = arith.constant 0 : index
      %c0_8 = arith.constant 0 : index
      %c0_9 = arith.constant 0 : index
      %16 = vector.load %arg3[%c0, %c0_8, %c0_9] : memref<1x256x32xf32, #tpu.memory_space<vmem>>, vector<1x256x32xf32>
      %17 = vector.shape_cast %16 : vector<1x256x32xf32> to vector<256x32xf32>
      %c0_10 = arith.constant 0 : index
      %c0_11 = arith.constant 0 : index
      %18 = vector.load %arg7[%c0_10, %c0_11] : memref<1x32xf32, #tpu.memory_space<vmem>>, vector<1x32xf32>
      %19 = arith.mulf %17, %17 : vector<256x32xf32>
      %cst = arith.constant dense<0.000000e+00> : vector<32xf32>
      %20 = vector.multi_reduction <add>, %19, %cst [0] : vector<256x32xf32> to vector<32xf32>
      %21 = vector.shape_cast %20 : vector<32xf32> to vector<1x32xf32>
      %22 = arith.addf %18, %21 : vector<1x32xf32>
      %c0_12 = arith.constant 0 : index
      %c0_13 = arith.constant 0 : index
      %23 = vector.load %arg7[%c0_12, %c0_13] : memref<1x32xf32, #tpu.memory_space<vmem>>, vector<1x32xf32>
      tpu.vector_store %arg7[%c0_12, %c0_13], %22 {strides = array<i32>} : memref<1x32xf32, #tpu.memory_space<vmem>>, vector<1x32xf32>,
    } else {
    }
    %c1_i32 = arith.constant 1 : i32
    %8 = arith.cmpi eq, %arg1, %c1_i32 : i32
    %c0_i32_4 = arith.constant 0 : i32
    %9 = arith.cmpi eq, %arg2, %c0_i32_4 : i32
    %10 = arith.andi %8, %9 : i1
    %11 = arith.extui %10 : i1 to i32
    %c0_i32_5 = arith.constant 0 : i32
    %12 = arith.cmpi ne, %11, %c0_i32_5 : i32
    scf.if %12 {
      %c0 = arith.constant 0 : index
      %c0_8 = arith.constant 0 : index
      %16 = vector.load %arg7[%c0, %c0_8] : memref<1x32xf32, #tpu.memory_space<vmem>>, vector<1x32xf32>
      %17 = math.sqrt %16 : vector<1x32xf32>
      %cst = arith.constant dense<0.000000e+00> : vector<1xf32>
      %18 = vector.multi_reduction <add>, %17, %cst [1] : vector<1x32xf32> to vector<1xf32>
      %19 = vector.shape_cast %18 : vector<1xf32> to vector<1x1xf32>
      %cst_9 = arith.constant 3.125000e-02 : f32
      %20 = vector.broadcast %cst_9 : f32 to vector<1x1xf32>
      %21 = arith.mulf %19, %20 : vector<1x1xf32>
      %cst_10 = arith.constant 9.99999997E-7 : f32
      %22 = vector.broadcast %cst_10 : f32 to vector<1x1xf32>
      %23 = arith.addf %21, %22 : vector<1x1xf32>
      %24 = vector.broadcast %23 : vector<1x1xf32> to vector<1x32xf32>
      %25 = arith.divf %17, %24 : vector<1x32xf32>
      %c0_11 = arith.constant 0 : index
      %c0_12 = arith.constant 0 : index
      %26 = vector.load %arg4[%c0_11, %c0_12] : memref<1x32xf32, #tpu.memory_space<vmem>>, vector<1x32xf32>
      %27 = arith.mulf %26, %25 : vector<1x32xf32>
      %cst_13 = arith.constant 1.000000e+00 : f32
      %28 = vector.broadcast %cst_13 : f32 to vector<1x32xf32>
      %29 = arith.addf %27, %28 : vector<1x32xf32>
      %c0_14 = arith.constant 0 : index
      %c0_15 = arith.constant 0 : index
      %30 = vector.load %arg8[%c0_14, %c0_15] : memref<1x32xf32, #tpu.memory_space<vmem>>, vector<1x32xf32>
      tpu.vector_store %arg8[%c0_14, %c0_15], %29 {strides = array<i32>} : memref<1x32xf32, #tpu.memory_space<vmem>>, vector<1x32xf32>,
    } else {
    }
    %c1_i32_6 = arith.constant 1 : i32
    %13 = arith.cmpi eq, %arg1, %c1_i32_6 : i32
    %14 = arith.extui %13 : i1 to i32
    %c0_i32_7 = arith.constant 0 : i32
    %15 = arith.cmpi ne, %14, %c0_i32_7 : i32
    scf.if %15 {
      %c0 = arith.constant 0 : index
      %c0_8 = arith.constant 0 : index
      %c0_9 = arith.constant 0 : index
      %16 = vector.load %arg3[%c0, %c0_8, %c0_9] : memref<1x256x32xf32, #tpu.memory_space<vmem>>, vector<1x256x32xf32>
      %17 = vector.shape_cast %16 : vector<1x256x32xf32> to vector<256x32xf32>
      %c0_10 = arith.constant 0 : index
      %c0_11 = arith.constant 0 : index
      %18 = vector.load %arg8[%c0_10, %c0_11] : memref<1x32xf32, #tpu.memory_space<vmem>>, vector<1x32xf32>
      %19 = vector.broadcast %18 : vector<1x32xf32> to vector<256x32xf32>
      %20 = arith.mulf %17, %19 : vector<256x32xf32>
      %c0_12 = arith.constant 0 : index
      %c0_13 = arith.constant 0 : index
      %21 = vector.load %arg5[%c0_12, %c0_13] : memref<1x32xf32, #tpu.memory_space<vmem>>, vector<1x32xf32>
      %22 = vector.broadcast %21 : vector<1x32xf32> to vector<256x32xf32>
      %23 = arith.addf %20, %22 : vector<256x32xf32>
      %c0_14 = arith.constant 0 : index
      %c0_15 = arith.constant 0 : index
      %c0_16 = arith.constant 0 : index
      %24 = vector.load %arg6[%c0_14, %c0_15, %c0_16] : memref<1x256x32xf32, #tpu.memory_space<vmem>>, vector<1x256x32xf32>
      %25 = vector.shape_cast %24 : vector<1x256x32xf32> to vector<256x32xf32>
      %26 = vector.shape_cast %23 : vector<256x32xf32> to vector<1x256x32xf32>
      tpu.vector_store %arg6[%c0_14, %c0_15, %c0_16], %26 {strides = array<i32>} : memref<1x256x32xf32, #tpu.memory_space<vmem>>, vector<1x256x32xf32>,
    } else {
    }
    return
  }
  func.func @transform_0(%arg0: i32, %arg1: i32, %arg2: i32) -> (i32, i32, i32) {
    %c0_i32 = arith.constant 0 : i32
    %c0_i32_0 = arith.constant 0 : i32
    return %arg0, %arg2, %c0_i32 : i32, i32, i32
  }
  func.func @transform_1(%arg0: i32, %arg1: i32, %arg2: i32) -> (i32, i32) {
    %c0_i32 = arith.constant 0 : i32
    %c0_i32_0 = arith.constant 0 : i32
    %c0_i32_1 = arith.constant 0 : i32
    return %c0_i32, %c0_i32_0 : i32, i32
  }
  func.func @transform_2(%arg0: i32, %arg1: i32, %arg2: i32) -> (i32, i32) {
    %c0_i32 = arith.constant 0 : i32
    %c0_i32_0 = arith.constant 0 : i32
    %c0_i32_1 = arith.constant 0 : i32
    return %c0_i32, %c0_i32_0 : i32, i32
  }
  func.func @transform_3(%arg0: i32, %arg1: i32, %arg2: i32) -> (i32, i32, i32) {
    %0 = arith.muli %arg1, %arg2 : i32
    %c0_i32 = arith.constant 0 : i32
    %c0_i32_0 = arith.constant 0 : i32
    return %arg0, %0, %c0_i32 : i32, i32, i32
  }
}

</mosaic_0001>

<bundles_post_ra>
// kernel: tpu_custom_call.1
= control target key start
LH: loop header
LB: loop body
LE: loop exit
PB: predicated region body
PF: predicated region fallthrough
CT: control target
= control target key end

     0   :  { %s765_s12 = smov 0   ;;  %s767_s13 = smov 0   ;;  %s1060_s0 = inlined_call_operand.vmem [shape: f32[2,256,32], index: 0, kind: input, shape index: {}]   ;;  %s1061_s1 = inlined_call_operand.vmem [shape: f32[1,32], index: 1, kind: input, shape index: {}]   ;;  %s1062_s2 = inlined_call_operand.vmem [shape: f32[1,32], index: 2, kind: input, shape index: {}]   ;;  %s1063_s3 = inlined_call_operand.vmem [shape: f32[2,256,32], index: 3, kind: output, shape index: {}]  }
   0x1   :  { %s769_s14 = smov 0   ;;  %s771_s15 = smov 0  }
   0x2   :  { %s773_s16 = smov 0  }
   0x3 LB: > { %s28_s17 = sadd.s32 1, %s734_s14  ;;  %s32_s18 = sadd.s32 1, %s738_s15  ;;  %s742_s16 = sphi %s773_s16, %s13_s16   ;;  %s738_s15 = sphi %s771_s15, %s1067_s15   ;;  %s734_s14 = sphi %s769_s14, %s1066_s14   ;;  %s730_s13 = sphi %s767_s13, %s1065_s13   ;;  %s726_s12 = sphi %s765_s12, %s1064_s12  }
   0x4   : > { %p30_p0 = scmp.ge.s32.totalorder %s28_s17, 2  ;;  %p642_p1 = scmp.ge.s32.totalorder %s742_s16, 1 }
   0x5   : > { %p167_p2 = scmp.lt.s32.totalorder %s742_s16, 5 }
   0x6   : > { %s1069_s17 = smov (%p30_p0, %s28_s17), 0  ;;  %s1071_s18 = smov (!%p30_p0, %s32_s18), %s738_s15 }
   0x7   : > { %p168_p3 = pnand %p642_p1, %p167_p2  ;;  %p34_p4 = scmp.ge.s32.totalorder %s1071_s18, 2 }
   0x8   : > { %p201_p5 = scmp.lt.s32.totalorder (!%p168_p3), %s730_s13, 1  ;;  %p222_p6 = scmp.eq.s32.totalorder (!%p168_p3), %s726_s12, 0 }
   0x9   : > { %s1073_s18 = smov (%p34_p4, %s1071_s18), 0  ;;  %171 = sbr.rel (%p168_p3) target bundleno = 327 (0x147), region = 32 }
   0xe   : > { %s1075_s13 = smov (!%p201_p5, %s730_s13), 1  ;;  %227 = sbr.rel (!%p222_p6) target bundleno = 19 (0x13), region = 36  ;;  %vm228_vm0 = vcmask (%p222_p6), 253952   ;;  %v744_v0 = vmov (%p222_p6), 0.0  }
   0xf   : > { %s655_s19 = sshll.u32 %s1075_s13, 8  ;;  %229 = vst.msk [vmem:[#allocation2] sm:$0x1] (%p222_p6), %vm228_vm0, %v744_v0 }
  0x10   : > { %s801_s22 = scalar_lea.vmem %s1060_s0, %s655_s19  ;;  %s806_s25 = scalar_lea.vmem %s1063_s3, %s655_s19 }
  0x13 PF: > { %p648_p7 = scmp.ne.s32.totalorder %s726_s12, 0 }
  0x15   : > { %232 = sbr.rel (%p648_p7) target bundleno = 107 (0x6b), region = 40 }
  0x1a   : > { %v233_v1 = vld [vmem:[%s801_s22] sm:$0xff]  ;;  %v234_v2 = vld [vmem:[%s801_s22 + $0x8] sm:$0xff]  ;;  %v235_v3 = vld [vmem:[%s801_s22 + $0x10] sm:$0xff]  ;;  %vm298_vm1 = vcmask 261120   ;;  %vm369_vm2 = vcmask 253952  }
  0x1b   : > { %v236_v4 = vld [vmem:[%s801_s22 + $0x18] sm:$0xff]  ;;  %v266_v5 = vmul.f32 %v233_v1, %v233_v1  ;;  %v267_v6 = vmul.f32 %v234_v2, %v234_v2  ;;  %v268_v7 = vmul.f32 %v235_v3, %v235_v3  ;;  %v237_v8 = vld [vmem:[%s801_s22 + $0x20] sm:$0xff]  ;;  %v238_v10 = vld [vmem:[%s801_s22 + $0x28] sm:$0xff] }
  0x1c   : > { %v269_v11 = vmul.f32 %v236_v4, %v236_v4  ;;  %v239_v13 = vld [vmem:[%s801_s22 + $0x30] sm:$0xff]  ;;  %v270_v15 = vmul.f32 %v237_v8, %v237_v8  ;;  %v240_v17 = vld [vmem:[%s801_s22 + $0x38] sm:$0xff]  ;;  %v271_v18 = vmul.f32 %v238_v10, %v238_v10  ;;  %v241_v22 = vld [vmem:[%s801_s22 + $0x40] sm:$0xff] }
  0x1d   : > { %v299_v9 = vsel %vm298_vm1, %v266_v5, 0.0  ;;  %v300_v12 = vsel %vm298_vm1, %v267_v6, 0.0  ;;  %v302_v16 = vsel %vm298_vm1, %v268_v7, 0.0  ;;  %v272_v20 = vmul.f32 %v239_v13, %v239_v13  ;;  %v242_v26 = vld [vmem:[%s801_s22 + $0x48] sm:$0xff]  ;;  %v243_v31 = vld [vmem:[%s801_s22 + $0x50] sm:$0xff]  ;;  %v244_v35 = vld [vmem:[%s801_s22 + $0x58] sm:$0xff] }
  0x1e   : > { %v301_v14 = vadd.f32 %v300_v12, %v299_v9  ;;  %v304_v21 = vsel %vm298_vm1, %v269_v11, 0.0  ;;  %v273_v24 = vmul.f32 %v240_v17, %v240_v17  ;;  %v306_v25 = vsel %vm298_vm1, %v270_v15, 0.0  ;;  %v245_v39 = vld [vmem:[%s801_s22 + $0x60] sm:$0xff]  ;;  %v246_v43 = vld [vmem:[%s801_s22 + $0x68] sm:$0xff]  ;;  %v247_v47 = vld [vmem:[%s801_s22 + $0x70] sm:$0xff] }
  0x1f   : > { %v308_v28 = vsel %vm298_vm1, %v271_v18, 0.0  ;;  %v274_v29 = vmul.f32 %v241_v22, %v241_v22  ;;  %v310_v30 = vsel %vm298_vm1, %v272_v20, 0.0  ;;  %v275_v33 = vmul.f32 %v242_v26, %v242_v26  ;;  %v248_v51 = vld [vmem:[%s801_s22 + $0x78] sm:$0xff]  ;;  %v249_v55 = vld [vmem:[%s801_s22 + $0x80] sm:$0xff]  ;;  %v250_v59 = vld [vmem:[%s801_s22 + $0x88] sm:$0xff] }
  0x20   : > { %v303_v19 = vadd.f32 %v302_v16, %v301_v14  ;;  %v312_v34 = vsel %vm298_vm1, %v273_v24, 0.0  ;;  %v276_v37 = vmul.f32 %v243_v31, %v243_v31  ;;  %v277_v41 = vmul.f32 %v244_v35, %v244_v35  ;;  %v251_v63 = vld [vmem:[%s801_s22 + $0x90] sm:$0xff]  ;;  %v252_v3 = vld [vmem:[%s801_s22 + $0x98] sm:$0xff]  ;;  %v253_v7 = vld [vmem:[%s801_s22 + $0xa0] sm:$0xff] }
  0x21   : > { %v314_v38 = vsel %vm298_vm1, %v274_v29, 0.0  ;;  %v316_v42 = vsel %vm298_vm1, %v275_v33, 0.0  ;;  %v278_v45 = vmul.f32 %v245_v39, %v245_v39  ;;  %v279_v49 = vmul.f32 %v246_v43, %v246_v43  ;;  %v254_v11 = vld [vmem:[%s801_s22 + $0xa8] sm:$0xff]  ;;  %v255_v15 = vld [vmem:[%s801_s22 + $0xb0] sm:$0xff]  ;;  %v260_v35 = vld [vmem:[%s801_s22 + $0xd8] sm:$0xff] }
  0x22   : > { %v305_v23 = vadd.f32 %v304_v21, %v303_v19  ;;  %v318_v46 = vsel %vm298_vm1, %v276_v37, 0.0  ;;  %v320_v50 = vsel %vm298_vm1, %v277_v41, 0.0  ;;  %v280_v53 = vmul.f32 %v247_v47, %v247_v47  ;;  %v256_v19 = vld [vmem:[%s801_s22 + $0xb8] sm:$0xff]  ;;  %v259_v31 = vld [vmem:[%s801_s22 + $0xd0] sm:$0xff]  ;;  %v261_v39 = vld [vmem:[%s801_s22 + $0xe0] sm:$0xff] }
  0x23   : > { %v322_v54 = vsel %vm298_vm1, %v278_v45, 0.0  ;;  %v281_v57 = vmul.f32 %v248_v51, %v248_v51  ;;  %v324_v58 = vsel %vm298_vm1, %v279_v49, 0.0  ;;  %v282_v61 = vmul.f32 %v249_v55, %v249_v55  ;;  %v262_v43 = vld [vmem:[%s801_s22 + $0xe8] sm:$0xff]  ;;  %v263_v47 = vld [vmem:[%s801_s22 + $0xf0] sm:$0xff]  ;;  %v264_v51 = vld [vmem:[%s801_s22 + $0xf8] sm:$0xff] }
  0x24   : > { %v307_v27 = vadd.f32 %v306_v25, %v305_v23  ;;  %v326_v62 = vsel %vm298_vm1, %v280_v53, 0.0  ;;  %v283_v1 = vmul.f32 %v250_v59, %v250_v59  ;;  %v284_v5 = vmul.f32 %v251_v63, %v251_v63  ;;  %v257_v23 = vld [vmem:[%s801_s22 + $0xc0] sm:$0xff] }
  0x25   : > { %v328_v2 = vsel %vm298_vm1, %v281_v57, 0.0  ;;  %v330_v6 = vsel %vm298_vm1, %v282_v61, 0.0  ;;  %v285_v9 = vmul.f32 %v252_v3, %v252_v3  ;;  %v286_v13 = vmul.f32 %v253_v7, %v253_v7 }
  0x26   : > { %v309_v32 = vadd.f32 %v308_v28, %v307_v27  ;;  %v332_v10 = vsel %vm298_vm1, %v283_v1, 0.0  ;;  %v334_v14 = vsel %vm298_vm1, %v284_v5, 0.0  ;;  %v287_v17 = vmul.f32 %v254_v11, %v254_v11  ;;  %v258_v27 = vld [vmem:[%s801_s22 + $0xc8] sm:$0xff]  ;;  %v265_v5 = vld [vmem:[#allocation2] sm:$0x1] }
  0x27   : > { %v336_v18 = vsel %vm298_vm1, %v285_v9, 0.0  ;;  %v288_v21 = vmul.f32 %v255_v15, %v255_v15  ;;  %v338_v22 = vsel %vm298_vm1, %v286_v13, 0.0  ;;  %v289_v25 = vmul.f32 %v256_v19, %v256_v19 }
  0x28   : > { %v311_v36 = vadd.f32 %v310_v30, %v309_v32  ;;  %v340_v26 = vsel %vm298_vm1, %v287_v17, 0.0  ;;  %v290_v29 = vmul.f32 %v257_v23, %v257_v23  ;;  %v291_v33 = vmul.f32 %v258_v27, %v258_v27 }
  0x29   : > { %v342_v30 = vsel %vm298_vm1, %v288_v21, 0.0  ;;  %v292_v37 = vmul.f32 %v259_v31, %v259_v31  ;;  %v293_v41 = vmul.f32 %v260_v35, %v260_v35  ;;  %v294_v45 = vmul.f32 %v261_v39, %v261_v39 }
  0x2a   : > { %v313_v40 = vadd.f32 %v312_v34, %v311_v36  ;;  %v344_v34 = vsel %vm298_vm1, %v289_v25, 0.0  ;;  %v295_v49 = vmul.f32 %v262_v43, %v262_v43  ;;  %v296_v53 = vmul.f32 %v263_v47, %v263_v47 }
  0x2c   : > { %v315_v44 = vadd.f32 %v314_v38, %v313_v40  ;;  %v346_v38 = vsel %vm298_vm1, %v290_v29, 0.0  ;;  %v356_v57 = vsel %vm298_vm1, %v295_v49, 0.0  ;;  %v358_v59 = vsel %vm298_vm1, %v296_v53, 0.0 }
  0x2e   : > { %v317_v48 = vadd.f32 %v316_v42, %v315_v44  ;;  %v348_v42 = vsel %vm298_vm1, %v291_v33, 0.0 }
  0x30   : > { %v319_v52 = vadd.f32 %v318_v46, %v317_v48  ;;  %v350_v46 = vsel %vm298_vm1, %v292_v37, 0.0 }
  0x32   : > { %v321_v56 = vadd.f32 %v320_v50, %v319_v52  ;;  %v352_v50 = vsel %vm298_vm1, %v293_v41, 0.0 }
  0x34   : > { %v323_v60 = vadd.f32 %v322_v54, %v321_v56  ;;  %v354_v54 = vsel %vm298_vm1, %v294_v45, 0.0  ;;  %v297_v56 = vmul.f32 %v264_v51, %v264_v51 }
  0x36   : > { %v325_v0 = vadd.f32 %v324_v58, %v323_v60  ;;  %v360_v61 = vsel %vm298_vm1, %v297_v56, 0.0 }
  0x38   : > { %v327_v4 = vadd.f32 %v326_v62, %v325_v0 }
  0x3a   : > { %v329_v8 = vadd.f32 %v328_v2, %v327_v4 }
  0x3c   : > { %v331_v12 = vadd.f32 %v330_v6, %v329_v8 }
  0x3e   : > { %v333_v16 = vadd.f32 %v332_v10, %v331_v12 }
  0x40   : > { %v335_v20 = vadd.f32 %v334_v14, %v333_v16 }
  0x42   : > { %v337_v24 = vadd.f32 %v336_v18, %v335_v20 }
  0x44   : > { %v339_v28 = vadd.f32 %v338_v22, %v337_v24 }
  0x46   : > { %v341_v32 = vadd.f32 %v340_v26, %v339_v28 }
  0x48   : > { %v343_v36 = vadd.f32 %v342_v30, %v341_v32 }
  0x4a   : > { %v345_v40 = vadd.f32 %v344_v34, %v343_v36 }
  0x4c   : > { %v347_v44 = vadd.f32 %v346_v38, %v345_v40 }
  0x4e   : > { %v349_v48 = vadd.f32 %v348_v42, %v347_v44 }
  0x50   : > { %v351_v52 = vadd.f32 %v350_v46, %v349_v48 }
  0x52   : > { %v353_v55 = vadd.f32 %v352_v50, %v351_v52 }
  0x54   : > { %v355_v58 = vadd.f32 %v354_v54, %v353_v55 }
  0x56   : > { %v357_v60 = vadd.f32 %v356_v57, %v355_v58 }
  0x58   : > { %v359_v62 = vadd.f32 %v358_v59, %v357_v60 }
  0x5a   : > { %v361_v63 = vadd.f32 %v360_v61, %v359_v62 }
  0x5c   : > { %v362_v0 = vrot.slane %v361_v63, 4 }
  0x5e   : > { %v363_v1 = vadd.f32 %v362_v0, %v361_v63 }
  0x60   : > { %v364_v2 = vrot.slane %v363_v1, 2 }
  0x62   : > { %v365_v3 = vadd.f32 %v364_v2, %v363_v1 }
  0x64   : > { %v366_v4 = vrot.slane %v365_v3, 1 }
  0x66   : > { %v367_v6 = vadd.f32 %v366_v4, %v365_v3 }
  0x68   : > { %v368_v7 = vadd.f32 %v367_v6, %v265_v5 }
  0x6a   : > { %370 = vst.msk [vmem:[#allocation2] sm:$0x1] %vm369_vm2, %v368_v7 }
  0x6b PF: > { %p371_p8 = scmp.eq.s32.totalorder %s726_s12, 1 }
  0x6c   : > { %vm384_vm5 = vcmask (%p371_p8), 253952   ;;  %v392_v19 = vld [vmem:[%s1061_s1] sm:$0x1] (%p371_p8) }
  0x6d   : > { %375 = sbr.rel (!%p371_p8) target bundleno = 296 (0x128), region = 44 }
  0x71   : > { %v376_v8 = vld [vmem:[#allocation2] sm:$0x1] (%p371_p8) }
  0x72   : > { %700 = vrsqrt.f32 %v376_v8  ;;  %vm379_vm3 = vcmp.eq.f32.partialorder %v376_v8, inf  ;;  %v382_v10 = vand.u32 2147483648, %v376_v8  ;;  %vm381_vm4 = vcmp.eq.f32.partialorder %v376_v8, 0.0 }
  0x7f   : > { %v701_v9 = vpop.eup %700 }
  0x80   : > { %v378_v11 = vmul.f32 %v701_v9, %v376_v8 }
  0x82   : > { %v380_v12 = vsel %vm379_vm3, %v376_v8, %v378_v11 }
  0x83   : > { %v383_v13 = vsel %vm381_vm4, %v382_v10, %v380_v12 }
  0x84   : > { %v385_v14 = vsel %vm384_vm5, %v383_v13, 0.0 }
  0x85   : > { %386 = vadd.xlane.f32.xlu0 %v385_v14 }
 0x10e   : > { %v387_v15 = vpop.xlane.xlu0 %386 }
 0x10f   : > { %v388_v16 = vmul.f32 0.03125, %v387_v15 }
 0x111   : > { %v389_v17 = vadd.f32 1e-06, %v388_v16 }
 0x113   : > { %702 = vrcp.f32 %v389_v17 }
 0x120   : > { %v703_v18 = vpop.eup %702 }
 0x121   : > { %v391_v20 = vmul.f32 %v703_v18, %v383_v13 }
 0x123   : > { %v393_v21 = vmul.f32 %v392_v19, %v391_v20 }
 0x125   : > { %v394_v22 = vadd.f32 1.0, %v393_v21 }
 0x127   : > { %395 = vst.msk [vmem:[#allocation3] sm:$0x1] %vm384_vm5, %v394_v22 }
 0x128 PF: > { %p650_p9 = scmp.ne.s32.totalorder %s726_s12, 1 }
 0x12a   : > { %398 = sbr.rel (%p650_p9) target bundleno = 327 (0x147), region = 48 }
 0x12f   : > { %v399_v23 = vld [vmem:[%s801_s22] sm:$0xff]  ;;  %v400_v27 = vld [vmem:[%s801_s22 + $0x8] sm:$0xff]  ;;  %v401_v28 = vld [vmem:[%s801_s22 + $0x10] sm:$0xff]  ;;  %vm509_vm6 = vcmask 261120  }
 0x130   : > { %v879_v24 = vld [vmem:[#allocation3] ss:$0 sm:$0xff]  ;;  %v884_v25 = vld [vmem:[%s1062_s2] ss:$0 sm:$0xff]  ;;  %v402_v29 = vld [vmem:[%s801_s22 + $0x18] sm:$0xff] }
 0x131   : > { %v438_v26 = vmul.f32 %v879_v24, %v399_v23  ;;  %v439_v30 = vmul.f32 %v879_v24, %v400_v27  ;;  %v440_v31 = vmul.f32 %v879_v24, %v401_v28  ;;  %v441_v32 = vmul.f32 %v879_v24, %v402_v29  ;;  %v403_v33 = vld [vmem:[%s801_s22 + $0x20] sm:$0xff]  ;;  %v404_v34 = vld [vmem:[%s801_s22 + $0x28] sm:$0xff]  ;;  %v405_v35 = vld [vmem:[%s801_s22 + $0x30] sm:$0xff] }
 0x132   : > { %v442_v37 = vmul.f32 %v879_v24, %v403_v33  ;;  %v443_v38 = vmul.f32 %v879_v24, %v404_v34  ;;  %v444_v39 = vmul.f32 %v879_v24, %v405_v35  ;;  %v406_v40 = vld [vmem:[%s801_s22 + $0x38] sm:$0xff]  ;;  %v407_v41 = vld [vmem:[%s801_s22 + $0x40] sm:$0xff]  ;;  %v408_v42 = vld [vmem:[%s801_s22 + $0x48] sm:$0xff] }
 0x133   : > { %v477_v36 = vadd.f32 %v884_v25, %v438_v26  ;;  %v478_v43 = vadd.f32 %v884_v25, %v439_v30  ;;  %v479_v44 = vadd.f32 %v884_v25, %v440_v31  ;;  %v480_v45 = vadd.f32 %v884_v25, %v441_v32  ;;  %v409_v47 = vld [vmem:[%s801_s22 + $0x50] sm:$0xff]  ;;  %v410_v48 = vld [vmem:[%s801_s22 + $0x58] sm:$0xff]  ;;  %v411_v49 = vld [vmem:[%s801_s22 + $0x60] sm:$0xff] }
 0x134   : > { %v445_v46 = vmul.f32 %v879_v24, %v406_v40  ;;  %v481_v50 = vadd.f32 %v884_v25, %v442_v37  ;;  %v482_v51 = vadd.f32 %v884_v25, %v443_v38  ;;  %v483_v52 = vadd.f32 %v884_v25, %v444_v39  ;;  %v412_v54 = vld [vmem:[%s801_s22 + $0x68] sm:$0xff]  ;;  %v413_v55 = vld [vmem:[%s801_s22 + $0x70] sm:$0xff]  ;;  %v414_v56 = vld [vmem:[%s801_s22 + $0x78] sm:$0xff] }
 0x135   : > { %510 = vst.msk [vmem:[%s806_s25] sm:$0xff] %vm509_vm6, %v477_v36  ;;  %v446_v53 = vmul.f32 %v879_v24, %v407_v41  ;;  %511 = vst.msk [vmem:[%s806_s25 + $0x8] sm:$0xff] %vm509_vm6, %v478_v43  ;;  %v447_v58 = vmul.f32 %v879_v24, %v408_v42  ;;  %v448_v59 = vmul.f32 %v879_v24, %v409_v47  ;;  %v415_v61 = vld [vmem:[%s801_s22 + $0x80] sm:$0xff]  ;;  %v416_v2 = vld [vmem:[%s801_s22 + $0x88] sm:$0xff] }
 0x136   : > { %512 = vst.msk [vmem:[%s806_s25 + $0x10] sm:$0xff] %vm509_vm6, %v479_v44  ;;  %513 = vst.msk [vmem:[%s806_s25 + $0x18] sm:$0xff] %vm509_vm6, %v480_v45  ;;  %v484_v57 = vadd.f32 %v884_v25, %v445_v46  ;;  %v449_v60 = vmul.f32 %v879_v24, %v410_v48  ;;  %v450_v63 = vmul.f32 %v879_v24, %v411_v49  ;;  %v417_v3 = vld [vmem:[%s801_s22 + $0x90] sm:$0xff]  ;;  %v418_v4 = vld [vmem:[%s801_s22 + $0x98] sm:$0xff] }
 0x137   : > { %514 = vst.msk [vmem:[%s806_s25 + $0x20] sm:$0xff] %vm509_vm6, %v481_v50  ;;  %515 = vst.msk [vmem:[%s806_s25 + $0x28] sm:$0xff] %vm509_vm6, %v482_v51  ;;  %v485_v62 = vadd.f32 %v884_v25, %v446_v53  ;;  %v451_v0 = vmul.f32 %v879_v24, %v412_v54  ;;  %v452_v1 = vmul.f32 %v879_v24, %v413_v55  ;;  %v419_v9 = vld [vmem:[%s801_s22 + $0xa0] sm:$0xff]  ;;  %v420_v10 = vld [vmem:[%s801_s22 + $0xa8] sm:$0xff] }
 0x138   : > { %516 = vst.msk [vmem:[%s806_s25 + $0x30] sm:$0xff] %vm509_vm6, %v483_v52  ;;  %517 = vst.msk [vmem:[%s806_s25 + $0x38] sm:$0xff] %vm509_vm6, %v484_v57  ;;  %v486_v5 = vadd.f32 %v884_v25, %v447_v58  ;;  %v487_v6 = vadd.f32 %v884_v25, %v448_v59  ;;  %v488_v7 = vadd.f32 %v884_v25, %v449_v60  ;;  %v421_v11 = vld [vmem:[%s801_s22 + $0xb0] sm:$0xff]  ;;  %v422_v16 = vld [vmem:[%s801_s22 + $0xb8] sm:$0xff] }
 0x139   : > { %v453_v8 = vmul.f32 %v879_v24, %v414_v56  ;;  %518 = vst.msk [vmem:[%s806_s25 + $0x40] sm:$0xff] %vm509_vm6, %v485_v62  ;;  %v489_v12 = vadd.f32 %v884_v25, %v450_v63  ;;  %v490_v13 = vadd.f32 %v884_v25, %v451_v0  ;;  %v491_v14 = vadd.f32 %v884_v25, %v452_v1  ;;  %v423_v21 = vld [vmem:[%s801_s22 + $0xc0] sm:$0xff]  ;;  %v424_v28 = vld [vmem:[%s801_s22 + $0xc8] sm:$0xff]  ;;  %v425_v29 = vld [vmem:[%s801_s22 + $0xd0] sm:$0xff] }
 0x13a   : > { %v454_v15 = vmul.f32 %v879_v24, %v415_v61  ;;  %519 = vst.msk [vmem:[%s806_s25 + $0x48] sm:$0xff] %vm509_vm6, %v486_v5  ;;  %520 = vst.msk [vmem:[%s806_s25 + $0x50] sm:$0xff] %vm509_vm6, %v487_v6  ;;  %v455_v18 = vmul.f32 %v879_v24, %v416_v2  ;;  %v456_v19 = vmul.f32 %v879_v24, %v417_v3  ;;  %v426_v30 = vld [vmem:[%s801_s22 + $0xd8] sm:$0xff]  ;;  %v427_v35 = vld [vmem:[%s801_s22 + $0xe0] sm:$0xff] }
 0x13b   : > { %521 = vst.msk [vmem:[%s806_s25 + $0x58] sm:$0xff] %vm509_vm6, %v488_v7  ;;  %v492_v17 = vadd.f32 %v884_v25, %v453_v8  ;;  %v457_v20 = vmul.f32 %v879_v24, %v418_v4  ;;  %522 = vst.msk [vmem:[%s806_s25 + $0x60] sm:$0xff] %vm509_vm6, %v489_v12  ;;  %v458_v23 = vmul.f32 %v879_v24, %v419_v9  ;;  %v428_v36 = vld [vmem:[%s801_s22 + $0xe8] sm:$0xff]  ;;  %v429_v37 = vld [vmem:[%s801_s22 + $0xf0] sm:$0xff] }
 0x13c   : > { %523 = vst.msk [vmem:[%s806_s25 + $0x68] sm:$0xff] %vm509_vm6, %v490_v13  ;;  %524 = vst.msk [vmem:[%s806_s25 + $0x70] sm:$0xff] %vm509_vm6, %v491_v14  ;;  %v493_v22 = vadd.f32 %v884_v25, %v454_v15  ;;  %v459_v26 = vmul.f32 %v879_v24, %v420_v10  ;;  %v460_v27 = vmul.f32 %v879_v24, %v421_v11  ;;  %v430_v42 = vld [vmem:[%s801_s22 + $0xf8] sm:$0xff] }
 0x13d   : > { %525 = vst.msk [vmem:[%s806_s25 + $0x78] sm:$0xff] %vm509_vm6, %v492_v17  ;;  %v494_v31 = vadd.f32 %v884_v25, %v455_v18  ;;  %v495_v32 = vadd.f32 %v884_v25, %v456_v19  ;;  %v496_v33 = vadd.f32 %v884_v25, %v457_v20  ;;  %v461_v34 = vmul.f32 %v879_v24, %v422_v16 }
 0x13e   : > { %526 = vst.msk [vmem:[%s806_s25 + $0x80] sm:$0xff] %vm509_vm6, %v493_v22  ;;  %v497_v38 = vadd.f32 %v884_v25, %v458_v23  ;;  %v498_v39 = vadd.f32 %v884_v25, %v459_v26  ;;  %v499_v40 = vadd.f32 %v884_v25, %v460_v27  ;;  %v462_v41 = vmul.f32 %v879_v24, %v423_v21 }
 0x13f   : > { %527 = vst.msk [vmem:[%s806_s25 + $0x88] sm:$0xff] %vm509_vm6, %v494_v31  ;;  %528 = vst.msk [vmem:[%s806_s25 + $0x90] sm:$0xff] %vm509_vm6, %v495_v32  ;;  %v500_v43 = vadd.f32 %v884_v25, %v461_v34  ;;  %v463_v44 = vmul.f32 %v879_v24, %v424_v28  ;;  %v464_v45 = vmul.f32 %v879_v24, %v425_v29 }
 0x140   : > { %529 = vst.msk [vmem:[%s806_s25 + $0x98] sm:$0xff] %vm509_vm6, %v496_v33  ;;  %v465_v46 = vmul.f32 %v879_v24, %v426_v30  ;;  %530 = vst.msk [vmem:[%s806_s25 + $0xa0] sm:$0xff] %vm509_vm6, %v497_v38  ;;  %v501_v47 = vadd.f32 %v884_v25, %v462_v41  ;;  %v466_v48 = vmul.f32 %v879_v24, %v427_v35 }
 0x141   : > { %531 = vst.msk [vmem:[%s806_s25 + $0xa8] sm:$0xff] %vm509_vm6, %v498_v39  ;;  %532 = vst.msk [vmem:[%s806_s25 + $0xb0] sm:$0xff] %vm509_vm6, %v499_v40  ;;  %v467_v49 = vmul.f32 %v879_v24, %v428_v36  ;;  %v468_v50 = vmul.f32 %v879_v24, %v429_v37  ;;  %v502_v51 = vadd.f32 %v884_v25, %v463_v44 }
 0x142   : > { %533 = vst.msk [vmem:[%s806_s25 + $0xb8] sm:$0xff] %vm509_vm6, %v500_v43  ;;  %v503_v52 = vadd.f32 %v884_v25, %v464_v45  ;;  %v504_v53 = vadd.f32 %v884_v25, %v465_v46  ;;  %v469_v54 = vmul.f32 %v879_v24, %v430_v42  ;;  %534 = vst.msk [vmem:[%s806_s25 + $0xc0] sm:$0xff] %vm509_vm6, %v501_v47 }
 0x143   : > { %v505_v55 = vadd.f32 %v884_v25, %v466_v48  ;;  %v506_v56 = vadd.f32 %v884_v25, %v467_v49  ;;  %v507_v57 = vadd.f32 %v884_v25, %v468_v50  ;;  %535 = vst.msk [vmem:[%s806_s25 + $0xc8] sm:$0xff] %vm509_vm6, %v502_v51 }
 0x144   : > { %536 = vst.msk [vmem:[%s806_s25 + $0xd0] sm:$0xff] %vm509_vm6, %v503_v52  ;;  %537 = vst.msk [vmem:[%s806_s25 + $0xd8] sm:$0xff] %vm509_vm6, %v504_v53  ;;  %v508_v58 = vadd.f32 %v884_v25, %v469_v54 }
 0x145   : > { %538 = vst.msk [vmem:[%s806_s25 + $0xe0] sm:$0xff] %vm509_vm6, %v505_v55  ;;  %539 = vst.msk [vmem:[%s806_s25 + $0xe8] sm:$0xff] %vm509_vm6, %v506_v56 }
 0x146   : > { %540 = vst.msk [vmem:[%s806_s25 + $0xf0] sm:$0xff] %vm509_vm6, %v507_v57  ;;  %541 = vst.msk [vmem:[%s806_s25 + $0xf8] sm:$0xff] %vm509_vm6, %v508_v58 }
 0x147 PF: > { %s13_s16 = sadd.s32 1, %s742_s16   ;;  %s1064_s12 = smov %s734_s14 }
 0x148   : > { %p10_p10 = scmp.ge.s32.totalorder %s13_s16, 6   ;;  %s1065_s13 = smov %s738_s15 }
 0x149   : > { %s1066_s14 = smov %s1069_s17  ;;  %s1067_s15 = smov %s1073_s18 }
 0x14a   :  { %12 = sbr.rel (!%p10_p10) target bundleno = 3 (0x3), region = 78 }

</bundles_post_ra>
